<compile_context>
chip_gen: v7x
topology: tpu7x:2x2x1
jax: 0.10.0
libtpu: 0.0.40
codegen_flags: <defaults>
</compile_context>

<pallas_src>
import functools

import jax
import jax.numpy as jnp
from jax.experimental import pallas as pl
from jax.experimental.pallas import tpu as pltpu

_EPS = 1e-5


def _round_up(x, m):
    return (x + m - 1) // m * m


def _pad_last(a, target):
    pad = target - a.shape[-1]
    if pad == 0:
        return a
    return jnp.pad(a, [(0, 0)] * (a.ndim - 1) + [(0, pad)])


# ---------------------------------------------------------------------------
# Fused single-call kernel (whole problem VMEM-resident; small batch).
# ---------------------------------------------------------------------------
def _fused_kernel(x_ref, w1_ref, gamma_ref, beta_ref, w2_ref, b2_ref, o_ref,
                  *, inv_n, eps):
    # Linear 1 on the MXU: bf16 feeds, f32 accumulation. b1 omitted (cancelled by BN).
    h = jnp.dot(x_ref[...].astype(jnp.bfloat16), w1_ref[...],
                preferred_element_type=jnp.float32)

    # BatchNorm1d (training mode): one reduction pass, biased variance.
    mean = jnp.sum(h, axis=0, keepdims=True) * inv_n
    ex2 = jnp.sum(h * h, axis=0, keepdims=True) * inv_n
    var = jnp.maximum(ex2 - mean * mean, 0.0)
    scale = gamma_ref[...] * jax.lax.rsqrt(var + eps)
    shift = beta_ref[...] - mean * scale

    # Normalize + ReLU fused.
    a = jnp.maximum(h * scale + shift, 0.0)

    # Linear 2 on the MXU (lane-dense padded output).
    out = jnp.dot(a.astype(jnp.bfloat16), w2_ref[...],
                  preferred_element_type=jnp.float32) + b2_ref[...]
    o_ref[...] = out.astype(o_ref.dtype)


# ---------------------------------------------------------------------------
# Large-batch path: two batch-tiled passes (BN needs global batch stats).
# ---------------------------------------------------------------------------
def _pass1_kernel(x_ref, w1_ref, h_ref, sum_ref, ssq_ref):
    h = jnp.dot(x_ref[...].astype(jnp.bfloat16), w1_ref[...],
                preferred_element_type=jnp.float32)
    h_ref[...] = h

    @pl.when(pl.program_id(0) == 0)
    def _():
        sum_ref[...] = jnp.zeros_like(sum_ref)
        ssq_ref[...] = jnp.zeros_like(ssq_ref)

    sum_ref[...] += jnp.sum(h, axis=0, keepdims=True)
    ssq_ref[...] += jnp.sum(h * h, axis=0, keepdims=True)


def _pass2_kernel(h_ref, scale_ref, shift_ref, w2_ref, b2_ref, o_ref):
    a = jnp.maximum(h_ref[...] * scale_ref[...] + shift_ref[...], 0.0)
    out = jnp.dot(a.astype(jnp.bfloat16), w2_ref[...],
                  preferred_element_type=jnp.float32) + b2_ref[...]
    o_ref[...] = out.astype(o_ref.dtype)


def prediction_mlp(x, w1, b1, gamma, beta, w2, b2, *,
                   eps=_EPS, tile_n=512, fused_max_n=1024):
    """Forward pass of PredictionMLP.

    x: (N, dim_in) f32. w1: (dim_in, hidden). w2: (hidden, out_dim) (PyTorch weights
    transposed to (in, out)). b1/b2/gamma/beta: 1-D per-feature params.
    Returns (N, out_dim) f32.
    """
    del b1  # cancelled exactly by the train-mode BatchNorm mean subtraction
    n, dim_in = x.shape
    hidden = w1.shape[1]
    out_dim = w2.shape[1]

    # Lane-dense padding of feature axes to multiples of 128 (zero pads are exact no-ops).
    hidden_p = _round_up(hidden, 128)
    out_p = _round_up(out_dim, 128)

    w1_p = _pad_last(w1, hidden_p).astype(jnp.bfloat16)
    gamma_p = _pad_last(gamma.reshape(1, hidden).astype(jnp.float32), hidden_p)
    beta_p = _pad_last(beta.reshape(1, hidden).astype(jnp.float32), hidden_p)
    w2_p = _pad_last(jnp.pad(w2, ((0, hidden_p - hidden), (0, 0))),
                     out_p).astype(jnp.bfloat16)
    b2_p = _pad_last(b2.reshape(1, out_dim).astype(jnp.float32), out_p)

    if n <= fused_max_n:
        # Toy / small batches: one grid-less call, everything VMEM-resident.
        vmem = pl.BlockSpec(memory_space=pltpu.MemorySpace.VMEM)
        out_pad = pl.pallas_call(
            functools.partial(_fused_kernel, inv_n=1.0 / n, eps=eps),
            out_shape=jax.ShapeDtypeStruct((n, out_p), jnp.float32),
            in_specs=[vmem] * 6,
            out_specs=vmem,
        )(x, w1_p, gamma_p, beta_p, w2_p, b2_p)
        return out_pad[:, :out_dim]

    # ---- Batch-tiled two-pass path ----
    n_p = _round_up(n, tile_n)
    x_p = jnp.pad(x, ((0, n_p - n), (0, 0)))   # zero rows contribute 0 to sum/sumsq
    num_tiles = n_p // tile_n
    vmem_limit = 32 * 1024 * 1024               # safe on v5e/v6e (128 MiB) and v7x (64 MiB)

    h, ssum, ssq = pl.pallas_call(
        _pass1_kernel,
        out_shape=(jax.ShapeDtypeStruct((n_p, hidden_p), jnp.float32),
                   jax.ShapeDtypeStruct((1, hidden_p), jnp.float32),
                   jax.ShapeDtypeStruct((1, hidden_p), jnp.float32)),
        grid=(num_tiles,),
        in_specs=[pl.BlockSpec((tile_n, dim_in), lambda i: (i, 0)),
                  pl.BlockSpec((dim_in, hidden_p), lambda i: (0, 0))],
        out_specs=(pl.BlockSpec((tile_n, hidden_p), lambda i: (i, 0)),
                   pl.BlockSpec((1, hidden_p), lambda i: (0, 0)),
                   pl.BlockSpec((1, hidden_p), lambda i: (0, 0))),
        compiler_params=pltpu.CompilerParams(
            dimension_semantics=("arbitrary",),   # stats accumulate across tiles
            vmem_limit_bytes=vmem_limit),
    )(x_p, w1_p)

    # Tiny (1, hidden) epilogue between passes: fold batch stats into scale/shift.
    inv_n = 1.0 / n
    mean = ssum * inv_n
    var = jnp.maximum(ssq * inv_n - mean * mean, 0.0)
    scale = gamma_p * jax.lax.rsqrt(var + eps)
    shift = beta_p - mean * scale

    out_pad = pl.pallas_call(
        _pass2_kernel,
        out_shape=jax.ShapeDtypeStruct((n_p, out_p), jnp.float32),
        grid=(num_tiles,),
        in_specs=[pl.BlockSpec((tile_n, hidden_p), lambda i: (i, 0)),
                  pl.BlockSpec((1, hidden_p), lambda i: (0, 0)),
                  pl.BlockSpec((1, hidden_p), lambda i: (0, 0)),
                  pl.BlockSpec((hidden_p, out_p), lambda i: (0, 0)),
                  pl.BlockSpec((1, out_p), lambda i: (0, 0))],
        out_specs=pl.BlockSpec((tile_n, out_p), lambda i: (i, 0)),
        compiler_params=pltpu.CompilerParams(
            dimension_semantics=("parallel",),    # independent tiles -> v7x megacore
            vmem_limit_bytes=vmem_limit),
    )(h, scale, shift, w2_p, b2_p)

    return out_pad[:n, :out_dim]


def _reference(x, w1, b1, gamma, beta, w2, b2, eps=_EPS):
    """Pure-JAX f32 reference of the PyTorch forward (train-mode BatchNorm1d)."""
    h = x @ w1 + b1
    m = h.mean(axis=0, keepdims=True)
    v = ((h - m) ** 2).mean(axis=0, keepdims=True)
    h = (h - m) / jnp.sqrt(v + eps) * gamma + beta
    h = jnp.maximum(h, 0.0)
    return h @ w2 + b2


if __name__ == "__main__":
    dim_in, hidden_dim, out_dim = 32, 64, 32

    key = jax.random.PRNGKey(0)
    kx1, kx2, kw1, kb1, kw2, kb2 = jax.random.split(key, 6)

    # PyTorch Linear default init: U(-1/sqrt(fan_in), 1/sqrt(fan_in)); BN gamma=1, beta=0.
    bound1 = 1.0 / (dim_in ** 0.5)
    w1 = jax.random.uniform(kw1, (dim_in, hidden_dim), jnp.float32, -bound1, bound1)
    b1 = jax.random.uniform(kb1, (hidden_dim,), jnp.float32, -bound1, bound1)
    gamma = jnp.ones((hidden_dim,), jnp.float32)
    beta = jnp.zeros((hidden_dim,), jnp.float32)
    bound2 = 1.0 / (hidden_dim ** 0.5)
    w2 = jax.random.uniform(kw2, (hidden_dim, out_dim), jnp.float32, -bound2, bound2)
    b2 = jax.random.uniform(kb2, (out_dim,), jnp.float32, -bound2, bound2)

    # Small batch -> fused single-call path.
    x_small = jax.random.normal(kx1, (8, dim_in), jnp.float32)
    out_small = prediction_mlp(x_small, w1, b1, gamma, beta, w2, b2)
    jax.block_until_ready(out_small)
    ref_small = _reference(x_small, w1, b1, gamma, beta, w2, b2)
    assert out_small.shape == ref_small.shape
    assert jnp.allclose(out_small, ref_small, atol=5e-2, rtol=5e-2), \
        "fused path mismatch vs reference"

    # Larger batch -> two-pass batch-tiled path.
    x_large = jax.random.normal(kx2, (2048, dim_in), jnp.float32)
    out_large = prediction_mlp(x_large, w1, b1, gamma, beta, w2, b2)
    jax.block_until_ready(out_large)
    ref_large = _reference(x_large, w1, b1, gamma, beta, w2, b2)
    assert out_large.shape == ref_large.shape
    assert jnp.allclose(out_large, ref_large, atol=5e-2, rtol=5e-2), \
        "tiled path mismatch vs reference"

    print("KERNEL_OK")
</pallas_src>

<mosaic_0001>
module attributes {stable_mosaic.version = 11 : i64} {
  func.func @_fused_kernel(%arg0: memref<8x32xf32, #tpu.memory_space<vmem>>, %arg1: memref<32x128xbf16, #tpu.memory_space<vmem>>, %arg2: memref<1x128xf32, #tpu.memory_space<vmem>>, %arg3: memref<1x128xf32, #tpu.memory_space<vmem>>, %arg4: memref<128x128xbf16, #tpu.memory_space<vmem>>, %arg5: memref<1x128xf32, #tpu.memory_space<vmem>>, %arg6: memref<8x128xf32, #tpu.memory_space<vmem>>) attributes {dimension_semantics = [], scalar_prefetch = 0 : i64, scratch_operands = 0 : i64, tpu.core_type = #tpu.core_type<tc>} {
    %c0 = arith.constant 0 : index
    %c0_0 = arith.constant 0 : index
    %0 = vector.load %arg0[%c0, %c0_0] : memref<8x32xf32, #tpu.memory_space<vmem>>, vector<8x32xf32>
    %1 = arith.truncf %0 : vector<8x32xf32> to vector<8x32xbf16>
    %c0_1 = arith.constant 0 : index
    %c0_2 = arith.constant 0 : index
    %2 = vector.load %arg1[%c0_1, %c0_2] : memref<32x128xbf16, #tpu.memory_space<vmem>>, vector<32x128xbf16>
    %cst = arith.constant dense<0.000000e+00> : vector<8x128xf32>
    %3 = tpu.matmul %1, %2, %cst {dimension_numbers = #tpu.dot_dimension_numbers<[1], [0], [0], [1], [0, 0, 1, 1], [], []>} : vector<8x32xbf16>, vector<32x128xbf16>, vector<8x128xf32> -> vector<8x128xf32>
    %cst_3 = arith.constant dense<0.000000e+00> : vector<128xf32>
    %4 = vector.multi_reduction <add>, %3, %cst_3 [0] : vector<8x128xf32> to vector<128xf32>
    %5 = vector.shape_cast %4 : vector<128xf32> to vector<1x128xf32>
    %cst_4 = arith.constant 1.250000e-01 : f32
    %6 = vector.broadcast %cst_4 : f32 to vector<1x128xf32>
    %7 = arith.mulf %5, %6 : vector<1x128xf32>
    %8 = arith.mulf %3, %3 : vector<8x128xf32>
    %cst_5 = arith.constant dense<0.000000e+00> : vector<128xf32>
    %9 = vector.multi_reduction <add>, %8, %cst_5 [0] : vector<8x128xf32> to vector<128xf32>
    %10 = vector.shape_cast %9 : vector<128xf32> to vector<1x128xf32>
    %cst_6 = arith.constant 1.250000e-01 : f32
    %11 = vector.broadcast %cst_6 : f32 to vector<1x128xf32>
    %12 = arith.mulf %10, %11 : vector<1x128xf32>
    %13 = arith.mulf %7, %7 : vector<1x128xf32>
    %14 = arith.subf %12, %13 : vector<1x128xf32>
    %cst_7 = arith.constant 0.000000e+00 : f32
    %15 = vector.broadcast %cst_7 : f32 to vector<1x128xf32>
    %16 = arith.maximumf %14, %15 : vector<1x128xf32>
    %c0_8 = arith.constant 0 : index
    %c0_9 = arith.constant 0 : index
    %17 = vector.load %arg2[%c0_8, %c0_9] : memref<1x128xf32, #tpu.memory_space<vmem>>, vector<1x128xf32>
    %cst_10 = arith.constant 9.99999974E-6 : f32
    %18 = vector.broadcast %cst_10 : f32 to vector<1x128xf32>
    %19 = arith.addf %16, %18 : vector<1x128xf32>
    %20 = math.rsqrt %19 : vector<1x128xf32>
    %21 = arith.mulf %17, %20 : vector<1x128xf32>
    %c0_11 = arith.constant 0 : index
    %c0_12 = arith.constant 0 : index
    %22 = vector.load %arg3[%c0_11, %c0_12] : memref<1x128xf32, #tpu.memory_space<vmem>>, vector<1x128xf32>
    %23 = arith.mulf %7, %21 : vector<1x128xf32>
    %24 = arith.subf %22, %23 : vector<1x128xf32>
    %25 = vector.broadcast %21 : vector<1x128xf32> to vector<8x128xf32>
    %26 = arith.mulf %3, %25 : vector<8x128xf32>
    %27 = vector.broadcast %24 : vector<1x128xf32> to vector<8x128xf32>
    %28 = arith.addf %26, %27 : vector<8x128xf32>
    %cst_13 = arith.constant 0.000000e+00 : f32
    %29 = vector.broadcast %cst_13 : f32 to vector<8x128xf32>
    %30 = arith.maximumf %28, %29 : vector<8x128xf32>
    %31 = arith.truncf %30 : vector<8x128xf32> to vector<8x128xbf16>
    %c0_14 = arith.constant 0 : index
    %c0_15 = arith.constant 0 : index
    %32 = vector.load %arg4[%c0_14, %c0_15] : memref<128x128xbf16, #tpu.memory_space<vmem>>, vector<128x128xbf16>
    %cst_16 = arith.constant dense<0.000000e+00> : vector<8x128xf32>
    %33 = tpu.matmul %31, %32, %cst_16 {dimension_numbers = #tpu.dot_dimension_numbers<[1], [0], [0], [1], [0, 0, 1, 1], [], []>} : vector<8x128xbf16>, vector<128x128xbf16>, vector<8x128xf32> -> vector<8x128xf32>
    %c0_17 = arith.constant 0 : index
    %c0_18 = arith.constant 0 : index
    %34 = vector.load %arg5[%c0_17, %c0_18] : memref<1x128xf32, #tpu.memory_space<vmem>>, vector<1x128xf32>
    %35 = vector.broadcast %34 : vector<1x128xf32> to vector<8x128xf32>
    %36 = arith.addf %33, %35 : vector<8x128xf32>
    %c0_19 = arith.constant 0 : index
    %c0_20 = arith.constant 0 : index
    %37 = vector.load %arg6[%c0_19, %c0_20] : memref<8x128xf32, #tpu.memory_space<vmem>>, vector<8x128xf32>
    tpu.vector_store %arg6[%c0_19, %c0_20], %36 {strides = array<i32>} : memref<8x128xf32, #tpu.memory_space<vmem>>, vector<8x128xf32>,
    return
  }
}

</mosaic_0001>

<bundles_post_ra>
// kernel: tpu_custom_call.1
= control target key start
LH: loop header
LB: loop body
LE: loop exit
PB: predicated region body
PF: predicated region fallthrough
CT: control target
= control target key end

     0   :  { %11 = vsyncpa [#allocation3], 0  ;;  %s567_s0 = inlined_call_operand.hbm [shape: f32[8,32], index: 0, kind: input, shape index: {}]   ;;  %s568_s1 = inlined_call_operand.hbm [shape: bf16[32,128], index: 1, kind: input, shape index: {}]   ;;  %s569_s2 = inlined_call_operand.vmem [shape: f32[1,128], index: 2, kind: input, shape index: {}]   ;;  %s570_s3 = inlined_call_operand.vmem [shape: f32[1,128], index: 3, kind: input, shape index: {}]   ;;  %s571_s4 = inlined_call_operand.hbm [shape: bf16[128,128], index: 4, kind: input, shape index: {}]   ;;  %s572_s5 = inlined_call_operand.vmem [shape: f32[1,128], index: 5, kind: input, shape index: {}]   ;;  %s573_s6 = inlined_call_operand.hbm [shape: f32[8,128], index: 6, kind: output, shape index: {}]  }
   0x1   :  { %12 = vsyncpa [#allocation6], 0 }
   0x2   :  { %13 = vsyncpa [#allocation4], 0  ;;  %s461_s21 = smov [#allocation5]   ;;  %s367_s25 = scalar_lea.hbm %s568_s1, 256 }
   0x3   :  { %s29_s22 = sshll.u32 %s461_s21, 4  ;;  %p368_p0 = scmp.ne.s32.totalorder %s568_s1, %s367_s25  ;;  %s30_s22 = int_to_ptr.vmem [resolvable:$true] %s29_s22 }
   0x4   :  { %p371_p1 = scmp.lt.u32.totalorder %s367_s25, %s568_s1 }
   0x6   :  { %p373_p2 = pnand %p371_p1, %p368_p0 }
   0x8   :  { %376 = shalt.err (!%p373_p2)
}
   0x9   :  { %s377_s30 = scalar_lea.vmem %s30_s22, 256  ;;  %p382_p4 = scmp.lt.s32.totalorder %s30_s22, %s30_s22 }
   0xa   :  { %p378_p3 = scmp.ne.s32.totalorder %s30_s22, %s377_s30  ;;  %p383_p5 = scmp.lt.s32.totalorder %s377_s30, %s377_s30 }
   0xc   :  { %p384_p6 = por %p383_p5, %p382_p4 }
   0xe   :  { %p385_p7 = pnand %p384_p6, %p378_p3 }
  0x10   :  { %388 = shalt.err (!%p385_p7)
}
  0x11   :  { %s462_s7 = smov 64   ;;  %s463_s8 = smov 4  }
  0x12   :  { %35 = dma.hbm_to_vmem [thread:$0]  %s568_s1, 256, %s30_s22, [#allocation6], %s462_s7, %s462_s7, %s463_s8  }
  0x13   :  { %s464_s11 = smov [#allocation2]   ;;  %s465_s13 = smov [#allocation7]  }
  0x14   :  { %s20_s12 = sshll.u32 %s464_s11, 4  ;;  %s45_s14 = sshll.u32 %s465_s13, 4  ;;  %s21_s12 = int_to_ptr.vmem [resolvable:$true] %s20_s12  ;;  %s46_s14 = int_to_ptr.vmem [resolvable:$true] %s45_s14 }
  0x15   :  { %s389_s17 = scalar_lea.hbm %s567_s0, 128 }
  0x16   :  { %p390_p8 = scmp.ne.s32.totalorder %s567_s0, %s389_s17  ;;  %p393_p9 = scmp.lt.u32.totalorder %s389_s17, %s567_s0 }
  0x18   :  { %p395_p10 = pnand %p393_p9, %p390_p8 }
  0x1a   :  { %398 = shalt.err (!%p395_p10)
}
  0x1b   :  { %s399_s1 = scalar_lea.vmem %s21_s12, 128  ;;  %p404_p12 = scmp.lt.s32.totalorder %s21_s12, %s21_s12 }
  0x1c   :  { %p400_p11 = scmp.ne.s32.totalorder %s21_s12, %s399_s1  ;;  %p405_p13 = scmp.lt.s32.totalorder %s399_s1, %s399_s1 }
  0x1e   :  { %p406_p0 = por %p405_p13, %p404_p12 }
  0x20   :  { %p407_p1 = pnand %p406_p0, %p400_p11 }
  0x22   :  { %410 = shalt.err (!%p407_p1)
}
  0x23   :  { %23 = dma.hbm_to_vmem [thread:$0]  %s567_s0, 128, %s21_s12, [#allocation3]  }
  0x24   :  { %s411_s26 = scalar_lea.hbm %s571_s4, 1024 }
  0x25   :  { %p412_p2 = scmp.ne.s32.totalorder %s571_s4, %s411_s26  ;;  %p415_p3 = scmp.lt.u32.totalorder %s411_s26, %s571_s4 }
  0x27   :  { %p417_p4 = pnand %p415_p3, %p412_p2 }
  0x29   :  { %420 = shalt.err (!%p417_p4)
}
  0x2a   :  { %s421_s9 = scalar_lea.vmem %s46_s14, 1024  ;;  %p426_p6 = scmp.lt.s32.totalorder %s46_s14, %s46_s14 }
  0x2b   :  { %p422_p5 = scmp.ne.s32.totalorder %s46_s14, %s421_s9  ;;  %p427_p7 = scmp.lt.s32.totalorder %s421_s9, %s421_s9 }
  0x2d   :  { %p428_p8 = por %p427_p7, %p426_p6 }
  0x2f   :  { %p429_p9 = pnand %p428_p8, %p422_p5 }
  0x31   :  { %432 = shalt.err (!%p429_p9)
}
  0x32   :  { %51 = dma.hbm_to_vmem [thread:$0]  %s571_s4, 1024, %s46_s14, [#allocation6], %s462_s7, %s462_s7, %s463_s8  }
  0x33   :  { %455 = dma.done.wait [#allocation3], 128  }
  0x34   :  { %456 = vsyncadd [#allocation3], 4294967168 }
  0x35   :  { %457 = dma.done.wait [#allocation6], 1280  }
  0x36   :  { %458 = vsyncadd [#allocation6], 4294966016  ;;  %v466_v0 = vmov 0.0   ;;  %vm467_vm0 = vmmov 0   ;;  %v355_v1 = vld [vmem:[#allocation5] sm:$0xff]   ;;  %v356_v2 = vld [vmem:[#allocation5 + $0x8] sm:$0xff]   ;;  %v152_v36 = vlaneseq }
  0x37   :  { %319 = vmatprep.subr.bf16.mxu0 %v466_v0  ;;  %323 = vmatprep.mubr.msk.bf16.mxu0 %vm467_vm0, %v466_v0  ;;  %v64_v3 = vld [vmem:[#allocation2] sm:$0xff]  ;;  %vm82_vm1 = vcmask 261120   ;;  %v357_v5 = vld [vmem:[#allocation7] sm:$0xff]   ;;  %v359_v7 = vld [vmem:[#allocation7 + $0x10] sm:$0xff]  }
  0x38   :  { %327 = vmatprep.subr.bf16.mxu1 %v466_v0  ;;  %343 = vmatprep.mubr.msk.bf16.mxu1 %vm467_vm0, %v466_v0  ;;  %v65_v4 = vpack.c.bf16 %v64_v3, %v64_v3  ;;  %v358_v6 = vld [vmem:[#allocation7 + $0x8] sm:$0xff]   ;;  %v360_v8 = vld [vmem:[#allocation7 + $0x18] sm:$0xff]   ;;  %v361_v9 = vld [vmem:[#allocation7 + $0x20] sm:$0xff]   ;;  %v153_v37 = vshrl.u32 %v152_v36, 7 }
  0x39   :  { %320 = vmatpush3.bf16.msra.mxu0 %v355_v1  ;;  %328 = vmatpush3.bf16.msra.mxu1 %v357_v5  ;;  %v362_v10 = vld [vmem:[#allocation7 + $0x28] sm:$0xff]   ;;  %v363_v11 = vld [vmem:[#allocation7 + $0x30] sm:$0xff]   ;;  %v364_v12 = vld [vmem:[#allocation7 + $0x38] sm:$0xff]  }
  0x3a   :  { %321 = vmatprep.subr.bf16.mxu0 %v466_v0  ;;  %329 = vmatprep.subr.bf16.mxu1 %v466_v0  ;;  %v144_v38 = vld [vmem:[%s569_s2] sm:$0x1]  ;;  %v154_v39 = vsub.s32 0, %v153_v37  ;;  %s468_s2 = smov [#allocation8]  }
  0x3b   :  { %v148_v42 = vld [vmem:[%s570_s3] sm:$0x1]  ;;  %s285_s14 = sshll.u32 %s468_s2, 4  ;;  %s286_s14 = int_to_ptr.vmem [resolvable:$true] %s285_s14 }
  0x3c   :  { %v298_v51 = vld [vmem:[%s572_s5] ss:$0 sm:$0xff]  ;;  %s433_s3 = scalar_lea.vmem %s286_s14, 128  ;;  %p438_p11 = scmp.lt.s32.totalorder %s286_s14, %s286_s14 }
  0x3d   :  { %322 = vmatpush3.bf16.msra.mxu0 %v356_v2  ;;  %330 = vmatpush3.bf16.msra.mxu1 %v358_v6  ;;  %p434_p10 = scmp.ne.s32.totalorder %s286_s14, %s433_s3  ;;  %p439_p12 = scmp.lt.s32.totalorder %s433_s3, %s433_s3 }
  0x3e   :  { %331 = vmatprep.subr.bf16.mxu1 %v466_v0 }
  0x3f   :  { %p440_p13 = por %p439_p12, %p438_p11 }
  0x40   :  { %324 = vmatmul.mubr.msk.bf16.vlgmr.msra.gmra.mrb[0].mxu0 %vm82_vm1, %v65_v4 }
  0x41   :  { %332 = vmatpush3.bf16.msra.mxu1 %v359_v7  ;;  %p441_p0 = pnand %p440_p13, %p434_p10 }
  0x42   :  { %333 = vmatprep.subr.bf16.mxu1 %v466_v0 }
  0x45   :  { %334 = vmatpush3.bf16.msra.mxu1 %v360_v8 }
  0x46   :  { %335 = vmatprep.subr.bf16.mxu1 %v466_v0 }
  0x49   :  { %336 = vmatpush3.bf16.msra.mxu1 %v361_v9 }
  0x4a   :  { %337 = vmatprep.subr.bf16.mxu1 %v466_v0 }
  0x4d   :  { %338 = vmatpush3.bf16.msra.mxu1 %v362_v10 }
  0x4e   :  { %339 = vmatprep.subr.bf16.mxu1 %v466_v0 }
  0x51   :  { %340 = vmatpush3.bf16.msra.mxu1 %v363_v11 }
  0x52   :  { %341 = vmatprep.subr.bf16.mxu1 %v466_v0 }
  0x55   :  { %342 = vmatpush3.bf16.msra.mxu1 %v364_v12 }
 0x113   :  { %v120_v13 = vpop.f32.mrb[0].mxu0 }
 0x114   :  { %v126_v14 = vrot.slane %v120_v13, 4  ;;  %v133_v15 = vmul.f32 %v120_v13, %v120_v13  ;;  %v325_v16 = vpop.f32.mrb[1].mxu0 }
 0x115   :  { %v123_v17 = vpop.f32.mrb[2].mxu0 }
 0x116   :  { %v127_v18 = vadd.f32 %v126_v14, %v120_v13  ;;  %v134_v19 = vrot.slane %v133_v15, 4  ;;  %v326_v20 = vpop.f32.mrb[3].mxu0 }
 0x118   :  { %v128_v21 = vrot.slane %v127_v18, 2  ;;  %v135_v22 = vadd.f32 %v134_v19, %v133_v15 }
 0x11a   :  { %v129_v23 = vadd.f32 %v128_v21, %v127_v18  ;;  %v136_v24 = vrot.slane %v135_v22, 2 }
 0x11c   :  { %v130_v25 = vrot.slane %v129_v23, 1  ;;  %v137_v26 = vadd.f32 %v136_v24, %v135_v22 }
 0x11e   :  { %v131_v27 = vadd.f32 %v130_v25, %v129_v23  ;;  %v138_v28 = vrot.slane %v137_v26, 1 }
 0x120   :  { %v132_v29 = vmul.f32 0.125, %v131_v27  ;;  %v139_v30 = vadd.f32 %v138_v28, %v137_v26 }
 0x122   :  { %v140_v31 = vmul.f32 0.125, %v139_v30  ;;  %v141_v32 = vmul.f32 %v132_v29, %v132_v29 }
 0x124   :  { %v142_v33 = vsub.f32 %v140_v31, %v141_v32 }
 0x126   :  { %v143_v34 = vmax.f32 %v142_v33, 0.0 }
 0x128   :  { %v145_v35 = vadd.f32 1e-05, %v143_v34 }
 0x12a   :  { %365 = vrsqrt.f32 %v145_v35 }
 0x134   :  { %v366_v40 = vpop.eup %365 }
 0x135   :  { %v147_v41 = vmul.f32 %v366_v40, %v144_v38 }
 0x137   :  { %v155_v43 = vrot.slane %v147_v41, %v154_v39  ;;  %v149_v44 = vmul.f32 %v147_v41, %v132_v29 }
 0x139   :  { %v150_v45 = vsub.f32 %v148_v42, %v149_v44  ;;  %v157_v46 = vmul.f32 %v155_v43, %v120_v13 }
 0x13b   :  { %v162_v47 = vrot.slane %v150_v45, %v154_v39 }
 0x13d   :  { %v164_v48 = vadd.f32 %v162_v47, %v157_v46 }
 0x13f   :  { %v165_v49 = vmax.f32 %v164_v48, 0.0 }
 0x141   :  { %v166_v50 = vpack.c.bf16 %v165_v49, %v165_v49 }
 0x143   :  { %344 = vmatmul.mubr.bf16.vlgmr.msra.gmra.mrb[0].mxu1 %v166_v50 }
 0x216   :  { %v272_v52 = vpop.f32.mrb[0].mxu1 }
 0x217   :  { %v273_v53 = vadd.f32 %v298_v51, %v272_v52  ;;  %v345_v54 = vpop.f32.mrb[1].mxu1 }
 0x218   :  { %v275_v55 = vpop.f32.mrb[2].mxu1 }
 0x219   :  { %278 = vst [vmem:[#allocation8] sm:$0xff] %v273_v53  ;;  %v346_v56 = vpop.f32.mrb[3].mxu1 }
 0x21a   :  { %444 = shalt.err (!%p441_p0)
}
 0x21b   :  { %s445_s5 = scalar_lea.hbm %s573_s6, 128 }
 0x21c   :  { %p446_p1 = scmp.ne.s32.totalorder %s573_s6, %s445_s5  ;;  %p449_p2 = scmp.lt.u32.totalorder %s445_s5, %s573_s6 }
 0x21e   :  { %p451_p3 = pnand %p449_p2, %p446_p1 }
 0x220   :  { %454 = shalt.err (!%p451_p3)
}
 0x221   :  { %288 = dma.vmem_to_hbm [thread:$0]  %s286_s14, 128, %s573_s6, [#allocation4]  }
 0x222   :  { %459 = dma.done.wait [#allocation4], 128  }
 0x223   :  { %460 = vsyncadd [#allocation4], 4294967168 }
 0x224   :  { %292 = vsyncpa [#allocation3], 1 }
 0x225   :  { %293 = vsyncpa [#allocation6], 1 }
 0x226   :  { %294 = vsyncpa [#allocation4], 1 }

</bundles_post_ra>
